<compile_context>
chip_gen: v5e
topology: v5e:2x2
jax: 0.10.0
libtpu: 0.0.40
codegen_flags: <defaults>
</compile_context>

<pallas_src>
import jax
import jax.numpy as jnp
from jax.experimental import pallas as pl
from jax.experimental.pallas import tpu as pltpu


def _simple_nn_kernel(x_ref, w1_ref, b1_ref, w2_ref, b2_ref, o_ref):
    # x_ref: (2, Bblk)   batch on lanes
    # w1_ref: (4, 2)     b1_ref: (4, 1)
    # w2_ref: (4, 1)     b2_ref: (1, 1)
    # o_ref: (1, Bblk)
    x0 = x_ref[0:1, :]                      # (1, Bblk)
    x1 = x_ref[1:2, :]                      # (1, Bblk)
    w1 = w1_ref[...]                        # (4, 2)

    # fc1 + ReLU on the VPU: h[j, b] = relu(W1[j,0]*x0[b] + W1[j,1]*x1[b] + b1[j])
    h = w1[:, 0:1] * x0 + w1[:, 1:2] * x1 + b1_ref[...]   # (4, Bblk)
    h = jnp.maximum(h, 0.0)

    # fc2 + Sigmoid: y[b] = sigmoid(sum_j W2[j]*h[j,b] + b2)
    y = jnp.sum(w2_ref[...] * h, axis=0, keepdims=True) + b2_ref[...]  # (1, Bblk)
    o_ref[...] = jax.nn.sigmoid(y).astype(o_ref.dtype)


def simple_nn_forward(x, w1, b1, w2, b2, *, block_b=512):
    """x: (B, 2) f32; w1: (4, 2); b1: (4,); w2: (1, 4); b2: (1,).  Returns (B, 1)."""
    B = x.shape[0]

    # Lane-dense layout (layout plumbing only, no compute hoisted into wrapper).
    x_t = x.T                               # (2, B)   batch on lanes
    b1_c = b1.reshape(4, 1).astype(jnp.float32)
    w2_t = w2.T.astype(jnp.float32)         # (4, 1)
    b2_c = b2.reshape(1, 1).astype(jnp.float32)

    # Pick a batch block: multiple of 128 lanes that divides B, else one full block.
    if block_b < B and B % block_b == 0 and block_b % 128 == 0:
        bb = block_b
    else:
        bb = B
    grid = (B // bb,)

    const = lambda shape: pl.BlockSpec(shape, lambda i: (0, 0))

    cost = pl.CostEstimate(
        flops=24 * B,            # ~16 (fc1) + ~8 (fc2) FMAs/adds per row
        transcendentals=B,       # one sigmoid per row
        bytes_accessed=12 * B + 64,
    )

    y_t = pl.pallas_call(
        _simple_nn_kernel,
        out_shape=jax.ShapeDtypeStruct((1, B), jnp.float32),
        grid=grid,
        in_specs=[
            pl.BlockSpec((2, bb), lambda i: (0, i)),   # x tile, pipelined over batch
            const((4, 2)),                             # W1 (resident)
            const((4, 1)),                             # b1 (resident)
            const((4, 1)),                             # W2^T (resident)
            const((1, 1)),                             # b2 (resident)
        ],
        out_specs=pl.BlockSpec((1, bb), lambda i: (0, i)),
        compiler_params=pltpu.CompilerParams(
            dimension_semantics=("parallel",),         # megacore split on v7x
        ),
        cost_estimate=cost,
    )(x_t, w1.astype(jnp.float32), b1_c, w2_t, b2_c)

    return y_t.reshape(B, 1)


def reference_forward(x, w1, b1, w2, b2):
    h = jnp.maximum(x @ w1.T + b1, 0.0)
    return jax.nn.sigmoid(h @ w2.T + b2)


if __name__ == "__main__":
    key = jax.random.PRNGKey(0)
    k_x, k_w1, k_b1, k_w2, k_b2 = jax.random.split(key, 5)

    B = 1024                                 # multiple of 128 -> lane-dense blocks
    x = jax.random.normal(k_x, (B, 2), dtype=jnp.float32)

    # PyTorch nn.Linear-style init: U(-1/sqrt(fan_in), +1/sqrt(fan_in))
    lim1 = 1.0 / (2.0 ** 0.5)
    w1 = jax.random.uniform(k_w1, (4, 2), jnp.float32, minval=-lim1, maxval=lim1)
    b1 = jax.random.uniform(k_b1, (4,), jnp.float32, minval=-lim1, maxval=lim1)
    lim2 = 0.5
    w2 = jax.random.uniform(k_w2, (1, 4), jnp.float32, minval=-lim2, maxval=lim2)
    b2 = jax.random.uniform(k_b2, (1,), jnp.float32, minval=-lim2, maxval=lim2)

    out = simple_nn_forward(x, w1, b1, w2, b2, block_b=256)   # grid=(4,)
    out = jax.block_until_ready(out)

    ref = reference_forward(x, w1, b1, w2, b2)
    assert out.shape == (B, 1), out.shape
    assert jnp.allclose(out, ref, atol=1e-5, rtol=1e-5), (out, ref)

    print("KERNEL_OK")
</pallas_src>

<mosaic_0001>
module attributes {stable_mosaic.version = 11 : i64} {
  func.func @_simple_nn_kernel(%arg0: i32, %arg1: memref<2x256xf32, #tpu.memory_space<vmem>>, %arg2: memref<4x2xf32, #tpu.memory_space<vmem>>, %arg3: memref<4x1xf32, #tpu.memory_space<vmem>>, %arg4: memref<4x1xf32, #tpu.memory_space<vmem>>, %arg5: memref<1x1xf32, #tpu.memory_space<vmem>>, %arg6: memref<1x256xf32, #tpu.memory_space<vmem>>) attributes {dimension_semantics = [#tpu.dimension_semantics<parallel>], iteration_bounds = array<i64: 4>, scalar_prefetch = 0 : i64, scratch_operands = 0 : i64, tpu.core_type = #tpu.core_type<tc>, window_params = [{transform_indices = @transform_0, window_bounds = array<i64: 2, 256>}, {pipeline_mode = #tpu.pipeline_mode<synchronous>, transform_indices = @transform_1, window_bounds = array<i64: 4, 2>}, {pipeline_mode = #tpu.pipeline_mode<synchronous>, transform_indices = @transform_2, window_bounds = array<i64: 4, 1>}, {pipeline_mode = #tpu.pipeline_mode<synchronous>, transform_indices = @transform_3, window_bounds = array<i64: 4, 1>}, {pipeline_mode = #tpu.pipeline_mode<synchronous>, transform_indices = @transform_4, window_bounds = array<i64: 1, 1>}, {transform_indices = @transform_5, window_bounds = array<i64: 1, 256>}]} {
    %c0 = arith.constant 0 : index
    %c0_0 = arith.constant 0 : index
    %0 = vector.load %arg1[%c0, %c0_0] : memref<2x256xf32, #tpu.memory_space<vmem>>, vector<1x256xf32>
    %c1 = arith.constant 1 : index
    %c0_1 = arith.constant 0 : index
    %1 = vector.load %arg1[%c1, %c0_1] : memref<2x256xf32, #tpu.memory_space<vmem>>, vector<1x256xf32>
    %c0_2 = arith.constant 0 : index
    %c0_3 = arith.constant 0 : index
    %2 = vector.load %arg2[%c0_2, %c0_3] : memref<4x2xf32, #tpu.memory_space<vmem>>, vector<4x2xf32>
    %3 = vector.extract_strided_slice %2 {offsets = [0, 0], sizes = [4, 1], strides = [1, 1]} : vector<4x2xf32> to vector<4x1xf32>
    %4 = vector.broadcast %3 : vector<4x1xf32> to vector<4x256xf32>
    %5 = vector.broadcast %0 : vector<1x256xf32> to vector<4x256xf32>
    %6 = arith.mulf %4, %5 : vector<4x256xf32>
    %7 = vector.extract_strided_slice %2 {offsets = [0, 1], sizes = [4, 1], strides = [1, 1]} : vector<4x2xf32> to vector<4x1xf32>
    %8 = vector.broadcast %7 : vector<4x1xf32> to vector<4x256xf32>
    %9 = vector.broadcast %1 : vector<1x256xf32> to vector<4x256xf32>
    %10 = arith.mulf %8, %9 : vector<4x256xf32>
    %11 = arith.addf %6, %10 : vector<4x256xf32>
    %c0_4 = arith.constant 0 : index
    %c0_5 = arith.constant 0 : index
    %12 = vector.load %arg3[%c0_4, %c0_5] : memref<4x1xf32, #tpu.memory_space<vmem>>, vector<4x1xf32>
    %13 = vector.broadcast %12 : vector<4x1xf32> to vector<4x256xf32>
    %14 = arith.addf %11, %13 : vector<4x256xf32>
    %cst = arith.constant 0.000000e+00 : f32
    %15 = vector.broadcast %cst : f32 to vector<4x256xf32>
    %16 = arith.maximumf %14, %15 : vector<4x256xf32>
    %c0_6 = arith.constant 0 : index
    %c0_7 = arith.constant 0 : index
    %17 = vector.load %arg4[%c0_6, %c0_7] : memref<4x1xf32, #tpu.memory_space<vmem>>, vector<4x1xf32>
    %18 = vector.broadcast %17 : vector<4x1xf32> to vector<4x256xf32>
    %19 = arith.mulf %18, %16 : vector<4x256xf32>
    %cst_8 = arith.constant dense<0.000000e+00> : vector<256xf32>
    %20 = vector.multi_reduction <add>, %19, %cst_8 [0] : vector<4x256xf32> to vector<256xf32>
    %21 = vector.shape_cast %20 : vector<256xf32> to vector<1x256xf32>
    %c0_9 = arith.constant 0 : index
    %c0_10 = arith.constant 0 : index
    %22 = vector.load %arg5[%c0_9, %c0_10] : memref<1x1xf32, #tpu.memory_space<vmem>>, vector<1x1xf32>
    %23 = vector.broadcast %22 : vector<1x1xf32> to vector<1x256xf32>
    %24 = arith.addf %21, %23 : vector<1x256xf32>
    %25 = arith.negf %24 : vector<1x256xf32>
    %26 = math.exp %25 : vector<1x256xf32>
    %cst_11 = arith.constant 1.000000e+00 : f32
    %27 = vector.broadcast %cst_11 : f32 to vector<1x256xf32>
    %28 = arith.addf %27, %26 : vector<1x256xf32>
    %29 = arith.divf %27, %28 : vector<1x256xf32>
    %c0_12 = arith.constant 0 : index
    %c0_13 = arith.constant 0 : index
    %30 = vector.load %arg6[%c0_12, %c0_13] : memref<1x256xf32, #tpu.memory_space<vmem>>, vector<1x256xf32>
    tpu.vector_store %arg6[%c0_12, %c0_13], %29 {strides = array<i32>} : memref<1x256xf32, #tpu.memory_space<vmem>>, vector<1x256xf32>,
    return
  }
  func.func @transform_0(%arg0: i32) -> (i32, i32) {
    %c0_i32 = arith.constant 0 : i32
    %c0_i32_0 = arith.constant 0 : i32
    return %c0_i32, %arg0 : i32, i32
  }
  func.func @transform_1(%arg0: i32) -> (i32, i32) {
    %c0_i32 = arith.constant 0 : i32
    %c0_i32_0 = arith.constant 0 : i32
    %c0_i32_1 = arith.constant 0 : i32
    return %c0_i32, %c0_i32_0 : i32, i32
  }
  func.func @transform_2(%arg0: i32) -> (i32, i32) {
    %c0_i32 = arith.constant 0 : i32
    %c0_i32_0 = arith.constant 0 : i32
    %c0_i32_1 = arith.constant 0 : i32
    return %c0_i32, %c0_i32_0 : i32, i32
  }
  func.func @transform_3(%arg0: i32) -> (i32, i32) {
    %c0_i32 = arith.constant 0 : i32
    %c0_i32_0 = arith.constant 0 : i32
    %c0_i32_1 = arith.constant 0 : i32
    return %c0_i32, %c0_i32_0 : i32, i32
  }
  func.func @transform_4(%arg0: i32) -> (i32, i32) {
    %c0_i32 = arith.constant 0 : i32
    %c0_i32_0 = arith.constant 0 : i32
    %c0_i32_1 = arith.constant 0 : i32
    return %c0_i32, %c0_i32_0 : i32, i32
  }
  func.func @transform_5(%arg0: i32) -> (i32, i32) {
    %c0_i32 = arith.constant 0 : i32
    %c0_i32_0 = arith.constant 0 : i32
    return %c0_i32, %arg0 : i32, i32
  }
}

</mosaic_0001>

<bundles_post_ra>
// kernel: tpu_custom_call.1
= control target key start
LH: loop header
LB: loop body
LE: loop exit
PB: predicated region body
PF: predicated region fallthrough
CT: control target
= control target key end

     0   :  { %s700_s0 = inlined_call_operand.vmem [shape: f32[2,1024], index: 0, kind: input, shape index: {}]   ;;  %s701_s1 = inlined_call_operand.vmem [shape: f32[4,2], index: 1, kind: input, shape index: {}]   ;;  %s702_s2 = inlined_call_operand.vmem [shape: f32[4,1], index: 2, kind: input, shape index: {}]   ;;  %s703_s3 = inlined_call_operand.vmem [shape: f32[4,1], index: 3, kind: input, shape index: {}]   ;;  %s704_s4 = inlined_call_operand.<no memory space> [shape: f32[1,1], index: 4, kind: input, shape index: {}]   ;;  %s705_s5 = inlined_call_operand.hbm [shape: f32[1,1024], index: 5, kind: output, shape index: {}]  }
   0x1   :  { %v10_v0 = vstv %s704_s4 }
   0x2   :  { %11 = vst [vmem:[#allocation2] sm:$0x1] %v10_v0 }
   0x3   :  { %12 = vsyncpa [#allocation4], 0 }
   0x4   :  { %14 = vsyncpa [#allocation4 + $0x1], 0  ;;  %s590_s20 = smov 0   ;;  %s592_s21 = smov 0  }
   0x5   :  { %s594_s22 = smov 0   ;;  %s596_s23 = smov 0  }
   0x6 LB: > { %s422_s4 = sadd.s32 4294967295, %s553_s23   ;;  %s423_s24 = sadd.s32 4294967294, %s553_s23   ;;  %s553_s23 = sphi %s596_s23, %s713_s23   ;;  %s549_s22 = sphi %s594_s22, %s712_s22   ;;  %s545_s21 = sphi %s592_s21, %s711_s21   ;;  %s541_s20 = sphi %s590_s20, %s710_s20  }
   0x7   : > { %s613_s25 = sadd.s32 1, %s553_s23   ;;  %s137_s26 = sadd.s32 1, %s549_s22 }
   0x8   : > { %s134_s27 = ssub.s32 %s553_s23, %s613_s25  ;;  %p147_p0 = scmp.ne.s32.totalorder %s549_s22, %s545_s21 }
   0x9   : > { %p135_p1 = scmp.eq.s32.totalorder %s134_s27, 0  ;;  %p148_p2 = scmp.eq.s32.totalorder %s422_s4, 3 }
   0xa   : > { %p153_p3 = scmp.ne.s32.totalorder %s545_s21, %s541_s20  ;;  %p154_p4 = scmp.eq.s32.totalorder %s423_s24, 3 }
   0xb   : > { %s625_s28 = scalar_select %p135_p1, %s549_s22, %s137_s26  }
   0xc   : > { %p627_p5 = por %p148_p2, %p147_p0  ;;  %p631_p6 = por %p154_p4, %p153_p3 }
   0xd   : > { %p426_p7 = scmp.ge.s32.totalorder %s553_s23, 1  ;;  %p193_p8 = scmp.lt.s32.totalorder %s553_s23, 5 }
   0xf   : > { %p194_p9 = pnand %p426_p7, %p193_p8 }
  0x10   : > { %s648_s12 = sshll.u32 (!%p194_p9), %s422_s4, 1  ;;  %s218_s18 = sand.u32 (!%p194_p9), 1, %s545_s21  }
  0x11   : > { %197 = sbr.rel (%p194_p9) target bundleno = 208 (0xd0), region = 40  ;;  %p222_p10 = scmp.lt.s32.totalorder (!%p194_p9), %s648_s12, 7 }
  0x12   : > { %s658_s19 = sshll.u32 (!%p194_p9), %s218_s18, 1  ;;  %s359_s26 = scalar_lea.hbm (!%p194_p9), %s705_s5, %s648_s12 }
  0x13   : > { %s220_s27 = scalar_lea.vmem (!%p194_p9), [#allocation3], %s658_s19  ;;  %s363_s7 = sshll.u32 (!%p194_p9), %s359_s26, 4  ;;  %s364_s7 = int_to_ptr.hbm [resolvable:$true] %s363_s7 }
  0x14   : > { %s361_s6 = sshll.u32 (!%p194_p9), %s220_s27, 4  ;;  %s349_s8 = scalar_lea.sflag (!%p194_p9), [#allocation4], %s218_s18  ;;  %s362_s6 = int_to_ptr.vmem [resolvable:$true] %s361_s6 }
  0x15   : > { %s505_s9 = sshra.s32 (!%p194_p9), %s364_s7, 4  ;;  %s506_s9 = int_to_ptr.hbm [resolvable:$true] %s505_s9 }
  0x16   : > { %v231_v1 = vld [vmem:[%s701_s1] sm:$0xf]  ;;  %v555_v3 = vmov 0   ;;  %v556_v6 = vmov 1   ;;  %s223_s13 = scalar_select %p222_p10, %s648_s12, 7  ;;  %vm275_vm0 = vcmask 1043456  }
  0x17   : > { %v257_v2 = vld [vmem:[%s702_s2] sm:$0xf]  ;;  %478 = vset.pattern.permute.xlu0 %v555_v3  ;;  %480 = vset.pattern.permute.xlu1 %v555_v3  ;;  %vm340_vm8 = vcmask 1040384   ;;  %s507_s10 = scalar_lea.hbm %s506_s9, 2  ;;  %p512_p0 = scmp.lt.s32.totalorder %s506_s9, %s705_s5 }
  0x18   : > { %v290_v4 = vld [vmem:[#allocation2] sm:$0x1]  ;;  %234 = vperm.xlu0 %478, %v231_v1   ;;  %260 = vperm.xlu1 %480, %v257_v2   ;;  %s429_s14 = sshll.u32 %s223_s13, 1  ;;  %p508_p11 = scmp.ne.s32.totalorder %s506_s9, %s507_s10 }
  0x19   : > { %481 = vset.pattern.permute.xlu2 %v555_v3  ;;  %v267_v5 = vld [vmem:[%s703_s3] sm:$0xf]  ;;  %s225_s17 = scalar_lea.vmem %s700_s0, %s429_s14  ;;  %s511_s13 = scalar_lea.hbm %s705_s5, 8 }
  0x1a   : > { %293 = vperm.xlu2 %481, %v290_v4   ;;  %v228_v8 = vld [vmem:[%s225_s17] ss:$2 sm:$0x3]  ;;  %v430_v9 = vld [vmem:[%s225_s17 + $0x1] ss:$2 sm:$0x3]  ;;  %v343_v4 = vlaneseq  ;;  %p509_p12 = pnand %p508_p11, %p627_p5  ;;  %p513_p1 = scmp.lt.s32.totalorder %s511_s13, %s507_s10 }
  0x1b   : > { %v238_v10 = vperm.slane %v228_v8, 0  ;;  %v239_v11 = vperm.slane %v228_v8, 1  ;;  %v249_v12 = vperm.slane %v430_v9, 0  ;;  %v250_v13 = vperm.slane %v430_v9, 1 }
  0x1c   : > { %vm345_vm10 = vcmp.lt.s32.totalorder %v343_v4, 256  ;;  %p510_p13 = pneg %p509_p12  ;;  %p514_p2 = por %p513_p1, %p512_p0 }
  0x1e   : > { %p515_p3 = pnand %p514_p2, %p510_p13 }
  0x20   : > { %479 = vset.pattern.permute.xlu0 %v556_v6  ;;  %270 = vperm.xlu1 %480, %v267_v5  }
  0x21   : > { %245 = vperm.xlu0 %479, %v231_v1  }
  0x29   : > { %482 = vset.pattern.permute.xlu0 %v555_v3 }
  0x74   : > { %v294_v37 = vpop.permute.xlu2 %293 }
  0x75   : > { %v296_v42 = vperm.slane %v294_v37, 0 }
  0x8a   : > { %v235_v7 = vpop.permute.xlu0 %234  ;;  %v261_v14 = vpop.permute.xlu1 %260 }
  0x8b   : > { %v242_v16 = vmul.f32 %v238_v10, %v235_v7  ;;  %v243_v17 = vmul.f32 %v239_v11, %v235_v7 }
  0x92   : > { %v271_v26 = vpop.permute.xlu1 %270 }
  0x93   : > { %v246_v15 = vpop.permute.xlu0 %245 }
  0x94   : > { %v253_v18 = vmul.f32 %v249_v12, %v246_v15  ;;  %v254_v19 = vmul.f32 %v250_v13, %v246_v15 }
  0x96   : > { %v255_v20 = vadd.f32 %v253_v18, %v242_v16  ;;  %v256_v21 = vadd.f32 %v254_v19, %v243_v17 }
  0x98   : > { %v263_v22 = vadd.f32 %v261_v14, %v255_v20  ;;  %v264_v23 = vadd.f32 %v261_v14, %v256_v21 }
  0x9a   : > { %v265_v24 = vmax.f32 %v263_v22, 0.0  ;;  %v266_v25 = vmax.f32 %v264_v23, 0.0 }
  0x9c   : > { %v273_v27 = vmul.f32 %v271_v26, %v265_v24  ;;  %v274_v28 = vmul.f32 %v271_v26, %v266_v25 }
  0x9e   : > { %v276_v29 = vsel %vm275_vm0, %v273_v27, 0.0  ;;  %v283_v30 = vsel %vm275_vm0, %v274_v28, 0.0 }
  0x9f   : > { %v277_v31 = vrot.slane %v276_v29, 4  ;;  %v284_v32 = vrot.slane %v283_v30, 4 }
  0xa1   : > { %v278_v33 = vadd.f32 %v277_v31, %v276_v29  ;;  %v285_v34 = vadd.f32 %v284_v32, %v283_v30 }
  0xa3   : > { %v279_v35 = vrot.slane %v278_v33, 2  ;;  %v286_v36 = vrot.slane %v285_v34, 2 }
  0xa5   : > { %v280_v38 = vadd.f32 %v279_v35, %v278_v33  ;;  %v287_v39 = vadd.f32 %v286_v36, %v285_v34 }
  0xa7   : > { %v281_v40 = vrot.slane %v280_v38, 1  ;;  %v288_v41 = vrot.slane %v287_v39, 1 }
  0xa9   : > { %v282_v43 = vadd.f32 %v281_v40, %v280_v38  ;;  %v289_v44 = vadd.f32 %v288_v41, %v287_v39 }
  0xab   : > { %v297_v45 = vadd.f32 %v296_v42, %v282_v43  ;;  %v298_v46 = vadd.f32 %v296_v42, %v289_v44 }
  0xad   : > { %v431_v47 = vmul.f32 -1.442695, %v297_v45  ;;  %v432_v48 = vmul.f32 -1.442695, %v298_v46 }
  0xaf   : > { %483 = vpow2.f32 %v431_v47 }
  0xb0   : > { %485 = vpow2.f32 %v432_v48 }
  0xb5   : > { %v484_v49 = vpop.eup %483 }
  0xb6   : > { %v486_v50 = vpop.eup %485  ;;  %v305_v51 = vadd.f32 1.0, %v484_v49 }
  0xb7   : > { %v306_v52 = vadd.f32 1.0, %v486_v50 }
  0xb8   : > { %487 = vrcp.f32 %v305_v51  ;;  %vm312_vm3 = vweird.f32 %v305_v51  ;;  %v318_v0 = vand.u32 2147483648, %v305_v51  ;;  %v316_v2 = vand.u32 2147483647, %v305_v51 }
  0xb9   : > { %489 = vrcp.f32 %v306_v52  ;;  %v333_v60 = vand.u32 2147483648, %v306_v52  ;;  %v331_v62 = vand.u32 2147483647, %v306_v52  ;;  %vm327_vm5 = vweird.f32 %v306_v52 }
  0xba   : > { %v319_v8 = vor.u32 1.1754944e-38, %v318_v0  ;;  %vm317_vm9 = vcmp.eq.f32.partialorder %v316_v2, 8.507059e+37 }
  0xbb   : > { %v334_v5 = vor.u32 1.1754944e-38, %v333_v60  ;;  %vm332_vm7 = vcmp.eq.f32.partialorder %v331_v62, 8.507059e+37 }
  0xbe   : > { %v488_v53 = vpop.eup %487 }
  0xbf   : > { %v490_v54 = vpop.eup %489  ;;  %v308_v55 = vmul.f32 %v488_v53, %v305_v51  ;;  %vm313_vm1 = vweird.f32 %v488_v53 }
  0xc0   : > { %v323_v56 = vmul.f32 %v490_v54, %v306_v52  ;;  %vm328_vm2 = vweird.f32 %v490_v54  ;;  %vm664_vm4 = vmor %vm312_vm3, %vm313_vm1 }
  0xc1   : > { %v309_v57 = vsub.f32 1.0, %v308_v55  ;;  %vm329_vm6 = vmor %vm327_vm5, %vm328_vm2 }
  0xc2   : > { %v324_v58 = vsub.f32 1.0, %v323_v56 }
  0xc3   : > { %v310_v59 = vmul.f32 %v488_v53, %v309_v57 }
  0xc4   : > { %v325_v61 = vmul.f32 %v490_v54, %v324_v58 }
  0xc5   : > { %v311_v63 = vadd.f32 %v488_v53, %v310_v59 }
  0xc6   : > { %v326_v3 = vadd.f32 %v490_v54, %v325_v61 }
  0xc7   : > { %v315_v6 = vsel %vm664_vm4, %v488_v53, %v311_v63 }
  0xc8   : > { %v330_v7 = vsel %vm329_vm6, %v490_v54, %v326_v3  ;;  %v320_v11 = vsel %vm317_vm9, %v319_v8, %v315_v6 }
  0xc9   : > { %v335_v9 = vsel %vm332_vm7, %v334_v5, %v330_v7 }
  0xca   : > { %v339_v10 = vrot.slane %v335_v9, 7 }
  0xcc   : > { %v341_v12 = vsel %vm340_vm8, %v320_v11, %v339_v10 }
  0xcd   : > { %347 = vst.msk [vmem:[%s220_s27] sm:$0x3] %vm345_vm10, %v341_v12 }
  0xce   : > { %518 = shalt.err (!%p515_p3)
}
  0xcf   : > { %437 = dma.vmem_to_hbm [thread:$0]  (%p627_p5), %s362_s6, 32, %s364_s7, %s349_s8  }
  0xd0 PF: > { %p443_p4 = scmp.ge.s32.totalorder %s553_s23, 2  ;;  %s375_s16 = sand.u32 1, %s541_s20  }
  0xd1   : > { %s376_s17 = scalar_lea.sflag [#allocation4], %s375_s16 }
  0xd2   : > { %p440_p7 = pnand %p443_p4, %p631_p6 }
  0xd4   : > { %p441_p8 = pneg %p440_p7 }
  0xd6   : > { %536 = dma.done.wait (%p441_p8), %s376_s17, 32  }
  0xd7   : > { %538 = vsyncadd (%p441_p8), %s376_s17, 4294967264  ;;  %p17_p9 = scmp.ge.s32.totalorder %s613_s25, 6   ;;  %s710_s20 = smov %s545_s21 }
  0xd8   : > { %s711_s21 = smov %s549_s22  ;;  %s712_s22 = smov %s625_s28 }
  0xd9   : > { %s713_s23 = smov %s613_s25  ;;  %19 = sbr.rel (!%p17_p9) target bundleno = 6 (0x6), region = 76 }
  0xde   :  { %382 = vsyncpa [#allocation4], 1 }
  0xdf   :  { %384 = vsyncpa [#allocation4 + $0x1], 1 }

</bundles_post_ra>
